<compile_context>
chip_gen: v6e
topology: v6e:2x2x1
jax: 0.10.0
libtpu: 0.0.40
codegen_flags: <defaults>
</compile_context>

<pallas_src>
import functools

import jax
import jax.numpy as jnp
from jax.experimental import pallas as pl
from jax.experimental.pallas import tpu as pltpu


def _i3d_head_kernel(x_ref, w_ref, b_ref, o_ref, acc_ref, *,
                     s_total, s_block, ragged_s):
    """x_ref: (NB, C, SB), w_ref: (C, Kp) pre-scaled by 1/S, b_ref: (1, Kp),
    o_ref: (NB, Kp), acc_ref: (NB, C) f32 scratch.  Grid = (n_tiles, s_tiles),
    the trailing S axis is the reduction ("arbitrary") axis."""
    s_idx = pl.program_id(1)

    @pl.when(s_idx == 0)
    def _():
        acc_ref[...] = jnp.zeros_like(acc_ref)

    x = x_ref[...]
    if ragged_s:
        # Mask the out-of-range lanes of the last (partial) S tile; for full
        # tiles the predicate is all-true, so this is globally correct.
        lane = jax.lax.broadcasted_iota(jnp.int32, x.shape, 2)
        x = jnp.where(s_idx * s_block + lane < s_total, x, 0)

    # Spatio-temporal partial sum over the S (lane) axis, f32 accumulation.
    acc_ref[...] += jnp.sum(x, axis=-1, dtype=jnp.float32)

    @pl.when(s_idx == pl.num_programs(1) - 1)
    def _():
        # Dropout is identity at inference (eval-mode nn.Dropout).
        # TODO(synk): training-mode dropout (stochastic masking) not implemented.
        pooled = acc_ref[...].astype(w_ref.dtype)   # (NB, C); 1/S folded into W
        logits = jnp.dot(pooled, w_ref[...], preferred_element_type=jnp.float32)
        o_ref[...] = (logits + b_ref[...].astype(jnp.float32)).astype(o_ref.dtype)


def i3d_head_forward(x, weight, bias, *, n_block=64):
    """x: (N, C, T, H, W); weight: (K, C) torch-style; bias: (K,) -> (N, K)."""
    N, C, T, H, W = x.shape
    K = weight.shape[0]
    S = T * H * W
    itemsize = jnp.dtype(x.dtype).itemsize
    w_itemsize = jnp.dtype(weight.dtype).itemsize

    # Native layout: collapse (T, H, W) -> S.  Contiguous reshape, no HBM copy.
    x_ncs = x.reshape(N, C, S)

    # --- Hardware-aware budgets --------------------------------------------
    try:
        info = pltpu.get_tpu_info()
        vmem_cap = int(getattr(info, "vmem_capacity_bytes", 64 << 20))
    except Exception:
        vmem_cap = 64 << 20                      # v7x-conservative fallback
    # ~8 MiB x tiles on v7x (64 MiB VMEM), ~16 MiB on v5e/v6e (128 MiB).
    target_bytes = int(max(4 << 20, min(vmem_cap // 8, 16 << 20)))

    # --- N tiling ------------------------------------------------------------
    if N <= 8:
        NB = N                                   # full-dim block (legal)
    else:
        # Multiple of 8; at least two N tiles so both v7x TensorCores get work.
        NB = max(8, min(int(n_block), (N // 2) // 8 * 8))
        min_sb = min(S, 128)
        while NB > 8 and NB * C * min_sb * itemsize > target_bytes:
            NB -= 8
        NB = max(8, NB)
    n_n_tiles = pl.cdiv(N, NB)
    # NOTE: when N % NB != 0 the last N block reads/writes OOB rows; Pallas
    # masks the output writes and garbage rows never mix with valid rows.

    # --- S tiling (lane axis): SB == S, or a multiple of 128, never padded ---
    sb = target_bytes // max(1, NB * C * itemsize)
    if sb >= S:
        SB = S
        n_s_tiles = 1
    else:
        n_s = pl.cdiv(S, max(128, int(sb)))
        SB = pl.cdiv(pl.cdiv(S, n_s), 128) * 128          # even split, 128-aligned
        SB = min(SB, pl.cdiv(S, 128) * 128)
        n_s_tiles = pl.cdiv(S, SB)
        if SB >= S:
            SB = S
            n_s_tiles = 1
    ragged_s = (n_s_tiles * SB) != S

    # --- Parameters: fold 1/S into W, pad K to a lane-dense multiple of 128 --
    K_pad = pl.cdiv(K, 128) * 128
    w_t = (weight * (1.0 / float(S))).T                     # (C, K), native dtype
    w_t = jnp.pad(w_t, ((0, 0), (0, K_pad - K)))            # (C, Kp)
    b = jnp.pad(bias, (0, K_pad - K)).reshape(1, K_pad)     # (1, Kp)

    grid = (n_n_tiles, n_s_tiles)

    # --- VMEM budget ----------------------------------------------------------
    x_tile_bytes = NB * C * SB * itemsize
    param_bytes = C * K_pad * w_itemsize + K_pad * jnp.dtype(b.dtype).itemsize
    out_bytes = 2 * NB * K_pad * itemsize
    acc_bytes = NB * C * 4
    needed = 2 * x_tile_bytes + param_bytes + out_bytes + acc_bytes
    vmem_limit = int(min(max(needed + (4 << 20), 32 << 20), (vmem_cap * 3) // 4))

    cost = pl.CostEstimate(
        flops=int(N * C * S + 2 * N * C * K),
        transcendentals=0,
        bytes_accessed=int(N * C * S * itemsize + C * K * w_itemsize
                           + K * w_itemsize + N * K * itemsize),
    )

    kernel = functools.partial(_i3d_head_kernel,
                               s_total=S, s_block=SB, ragged_s=ragged_s)

    out = pl.pallas_call(
        kernel,
        out_shape=jax.ShapeDtypeStruct((N, K_pad), x.dtype),
        grid_spec=pltpu.PrefetchScalarGridSpec(
            num_scalar_prefetch=0,
            grid=grid,
            in_specs=[
                pl.BlockSpec((NB, C, SB), lambda n, s: (n, 0, s)),
                # Grid-invariant params: single-buffered (no double-buffer waste).
                pl.BlockSpec((C, K_pad), lambda n, s: (0, 0),
                             pipeline_mode=pl.Buffered(1)),
                pl.BlockSpec((1, K_pad), lambda n, s: (0, 0),
                             pipeline_mode=pl.Buffered(1)),
            ],
            out_specs=pl.BlockSpec((NB, K_pad), lambda n, s: (n, 0)),
            scratch_shapes=[pltpu.VMEM((NB, C), jnp.float32)],
        ),
        compiler_params=pltpu.CompilerParams(
            # N tiles shard across the 2 v7x TensorCores; the S reduction is
            # the trailing sequential axis.
            dimension_semantics=("parallel", "arbitrary"),
            vmem_limit_bytes=vmem_limit,
        ),
        cost_estimate=cost,
    )(x_ncs, w_t, b)

    return out[:, :K]


if __name__ == "__main__":
    # Small shapes consistent with the module's forward.
    N, C, T, H, W = 2, 32, 4, 8, 8        # batch, in_channels, temporal, spatial
    num_classes = 16

    key = jax.random.PRNGKey(0)
    kx, kw = jax.random.split(key)

    x = jax.random.normal(kx, (N, C, T, H, W), dtype=jnp.float32)

    # Deterministic init mirroring init_weights(): normal(std=0.01), bias 0.
    init_std = 0.01
    weight = init_std * jax.random.normal(kw, (num_classes, C), dtype=jnp.float32)
    bias = jnp.zeros((num_classes,), dtype=jnp.float32)

    out = i3d_head_forward(x, weight, bias)
    jax.block_until_ready(out)

    # Sanity check against a pure-JAX reference.
    ref = jnp.mean(x.reshape(N, C, -1), axis=-1) @ weight.T + bias
    assert out.shape == (N, num_classes)
    assert jnp.allclose(out, ref, atol=2e-4, rtol=1e-3), \
        float(jnp.max(jnp.abs(out - ref)))

    print("KERNEL_OK")
</pallas_src>

<mosaic_0001>
module attributes {stable_mosaic.version = 11 : i64} {
  func.func @_i3d_head_kernel(%arg0: i32, %arg1: i32, %arg2: memref<2x32x256xf32, #tpu.memory_space<vmem>>, %arg3: memref<32x128xf32, #tpu.memory_space<vmem>>, %arg4: memref<1x128xf32, #tpu.memory_space<vmem>>, %arg5: memref<2x128xf32, #tpu.memory_space<vmem>>, %arg6: memref<2x32xf32, #tpu.memory_space<vmem>>) attributes {dimension_semantics = [#tpu.dimension_semantics<parallel>, #tpu.dimension_semantics<arbitrary>], iteration_bounds = array<i64: 1, 1>, scalar_prefetch = 0 : i64, scratch_operands = 1 : i64, tpu.core_type = #tpu.core_type<tc>, window_params = [{transform_indices = @transform_0, window_bounds = array<i64: 2, 32, 256>}, {pipeline_mode = #tpu.pipeline_mode<synchronous>, transform_indices = @transform_1, window_bounds = array<i64: 32, 128>}, {pipeline_mode = #tpu.pipeline_mode<synchronous>, transform_indices = @transform_2, window_bounds = array<i64: 1, 128>}, {transform_indices = @transform_3, window_bounds = array<i64: 2, 128>}]} {
    %c0_i32 = arith.constant 0 : i32
    %0 = arith.cmpi eq, %arg1, %c0_i32 : i32
    %1 = arith.extui %0 : i1 to i32
    %c0_i32_0 = arith.constant 0 : i32
    %2 = arith.cmpi ne, %1, %c0_i32_0 : i32
    scf.if %2 {
      %cst_9 = arith.constant 0.000000e+00 : f32
      %11 = vector.broadcast %cst_9 : f32 to vector<2x32xf32>
      %c0_10 = arith.constant 0 : index
      %c0_11 = arith.constant 0 : index
      %12 = vector.load %arg6[%c0_10, %c0_11] : memref<2x32xf32, #tpu.memory_space<vmem>>, vector<2x32xf32>
      tpu.vector_store %arg6[%c0_10, %c0_11], %11 {strides = array<i32>} : memref<2x32xf32, #tpu.memory_space<vmem>>, vector<2x32xf32>,
    } else {
    }
    %c0 = arith.constant 0 : index
    %c0_1 = arith.constant 0 : index
    %c0_2 = arith.constant 0 : index
    %3 = vector.load %arg2[%c0, %c0_1, %c0_2] : memref<2x32x256xf32, #tpu.memory_space<vmem>>, vector<2x32x256xf32>
    %c0_3 = arith.constant 0 : index
    %c0_4 = arith.constant 0 : index
    %4 = vector.load %arg6[%c0_3, %c0_4] : memref<2x32xf32, #tpu.memory_space<vmem>>, vector<2x32xf32>
    %cst = arith.constant dense<0.000000e+00> : vector<2x32xf32>
    %5 = vector.multi_reduction <add>, %3, %cst [2] : vector<2x32x256xf32> to vector<2x32xf32>
    %6 = arith.addf %4, %5 : vector<2x32xf32>
    %c0_5 = arith.constant 0 : index
    %c0_6 = arith.constant 0 : index
    %7 = vector.load %arg6[%c0_5, %c0_6] : memref<2x32xf32, #tpu.memory_space<vmem>>, vector<2x32xf32>
    tpu.vector_store %arg6[%c0_5, %c0_6], %6 {strides = array<i32>} : memref<2x32xf32, #tpu.memory_space<vmem>>, vector<2x32xf32>,
    %c0_i32_7 = arith.constant 0 : i32
    %8 = arith.cmpi eq, %arg1, %c0_i32_7 : i32
    %9 = arith.extui %8 : i1 to i32
    %c0_i32_8 = arith.constant 0 : i32
    %10 = arith.cmpi ne, %9, %c0_i32_8 : i32
    scf.if %10 {
      %c0_9 = arith.constant 0 : index
      %c0_10 = arith.constant 0 : index
      %11 = vector.load %arg6[%c0_9, %c0_10] : memref<2x32xf32, #tpu.memory_space<vmem>>, vector<2x32xf32>
      %c0_11 = arith.constant 0 : index
      %c0_12 = arith.constant 0 : index
      %12 = vector.load %arg3[%c0_11, %c0_12] : memref<32x128xf32, #tpu.memory_space<vmem>>, vector<32x128xf32>
      %cst_13 = arith.constant dense<0.000000e+00> : vector<2x128xf32>
      %13 = tpu.matmul %11, %12, %cst_13 {dimension_numbers = #tpu.dot_dimension_numbers<[1], [0], [0], [1], [0, 0, 1, 1], [], []>} : vector<2x32xf32>, vector<32x128xf32>, vector<2x128xf32> -> vector<2x128xf32>
      %c0_14 = arith.constant 0 : index
      %c0_15 = arith.constant 0 : index
      %14 = vector.load %arg4[%c0_14, %c0_15] : memref<1x128xf32, #tpu.memory_space<vmem>>, vector<1x128xf32>
      %15 = vector.broadcast %14 : vector<1x128xf32> to vector<2x128xf32>
      %16 = arith.addf %13, %15 : vector<2x128xf32>
      %c0_16 = arith.constant 0 : index
      %c0_17 = arith.constant 0 : index
      %17 = vector.load %arg5[%c0_16, %c0_17] : memref<2x128xf32, #tpu.memory_space<vmem>>, vector<2x128xf32>
      tpu.vector_store %arg5[%c0_16, %c0_17], %16 {strides = array<i32>} : memref<2x128xf32, #tpu.memory_space<vmem>>, vector<2x128xf32>,
    } else {
    }
    return
  }
  func.func @transform_0(%arg0: i32, %arg1: i32) -> (i32, i32, i32) {
    %c0_i32 = arith.constant 0 : i32
    %c0_i32_0 = arith.constant 0 : i32
    return %arg0, %c0_i32, %arg1 : i32, i32, i32
  }
  func.func @transform_1(%arg0: i32, %arg1: i32) -> (i32, i32) {
    %c0_i32 = arith.constant 0 : i32
    %c0_i32_0 = arith.constant 0 : i32
    %c0_i32_1 = arith.constant 0 : i32
    return %c0_i32, %c0_i32_0 : i32, i32
  }
  func.func @transform_2(%arg0: i32, %arg1: i32) -> (i32, i32) {
    %c0_i32 = arith.constant 0 : i32
    %c0_i32_0 = arith.constant 0 : i32
    %c0_i32_1 = arith.constant 0 : i32
    return %c0_i32, %c0_i32_0 : i32, i32
  }
  func.func @transform_3(%arg0: i32, %arg1: i32) -> (i32, i32) {
    %c0_i32 = arith.constant 0 : i32
    %c0_i32_0 = arith.constant 0 : i32
    return %arg0, %c0_i32 : i32, i32
  }
}

</mosaic_0001>

<bundles_post_ra>
// kernel: tpu_custom_call.1
= control target key start
LH: loop header
LB: loop body
LE: loop exit
PB: predicated region body
PF: predicated region fallthrough
CT: control target
= control target key end

     0   :  { %8 = vsyncpa [#allocation4], 0  ;;  %s392_s0 = inlined_call_operand.hbm [shape: f32[2,32,256], index: 0, kind: input, shape index: {}]   ;;  %s393_s1 = inlined_call_operand.hbm [shape: f32[32,128], index: 1, kind: input, shape index: {}]   ;;  %s394_s2 = inlined_call_operand.vmem [shape: f32[1,128], index: 2, kind: input, shape index: {}]   ;;  %s395_s3 = inlined_call_operand.hbm [shape: f32[2,128], index: 3, kind: output, shape index: {}]  }
   0x1   :  { %9 = vsyncpa [#allocation7], 0 }
   0x2   :  { %10 = vsyncpa [#allocation5], 0  ;;  %s349_s12 = smov [#allocation3]  }
   0x3   :  { %s16_s13 = sshll.u32 %s349_s12, 4  ;;  %s17_s13 = int_to_ptr.vmem [resolvable:$true] %s16_s13 }
   0x4   :  { %s291_s14 = scalar_lea.vmem %s17_s13, 2048  ;;  %p296_p1 = scmp.lt.s32.totalorder %s17_s13, %s17_s13 }
   0x5   :  { %p292_p0 = scmp.ne.s32.totalorder %s17_s13, %s291_s14  ;;  %p297_p2 = scmp.lt.s32.totalorder %s291_s14, %s291_s14 }
   0x7   :  { %p298_p3 = por %p297_p2, %p296_p1 }
   0x9   :  { %p299_p4 = pnand %p298_p3, %p292_p0 }
   0xb   :  { %302 = shalt.err (!%p299_p4)
}
   0xc   :  { %s350_s15 = smov 256   ;;  %s351_s16 = smov 16  }
   0xd   :  { %22 = dma.hbm_to_vmem [thread:$0]  %s392_s0, 2048, %s17_s13, [#allocation4], %s350_s15, %s350_s15, %s351_s16  }
   0xe   :  { %s352_s19 = smov [#allocation6]  }
   0xf   :  { %s28_s20 = sshll.u32 %s352_s19, 4  ;;  %s29_s20 = int_to_ptr.vmem [resolvable:$true] %s28_s20 }
  0x10   :  { %s311_s21 = scalar_lea.vmem %s29_s20, 512  ;;  %p316_p6 = scmp.lt.s32.totalorder %s29_s20, %s29_s20 }
  0x11   :  { %p312_p5 = scmp.ne.s32.totalorder %s29_s20, %s311_s21  ;;  %p317_p7 = scmp.lt.s32.totalorder %s311_s21, %s311_s21 }
  0x13   :  { %p318_p8 = por %p317_p7, %p316_p6 }
  0x15   :  { %p319_p9 = pnand %p318_p8, %p312_p5 }
  0x17   :  { %322 = shalt.err (!%p319_p9)
}
  0x18   :  { %s353_s22 = smov 128   ;;  %s354_s23 = smov 8  }
  0x19   :  { %34 = dma.hbm_to_vmem [thread:$0]  %s393_s1, 512, %s29_s20, [#allocation7], %s353_s22, %s353_s22, %s354_s23  }
  0x1a   :  { %343 = dma.done.wait [#allocation4], 2048  }
  0x1b   :  { %344 = vsyncadd [#allocation4], 4294965248 }
  0x1c   :  { %345 = dma.done.wait [#allocation7], 512  }
  0x1d   :  { %346 = vsyncadd [#allocation7], 4294966784  ;;  %v57_v0 = vld [vmem:[#allocation3 + $0x40] sm:$0xff]  ;;  %v58_v1 = vld [vmem:[#allocation3 + $0x48] sm:$0xff]  ;;  %vm47_vm0 = vcmask 254976   ;;  %v355_v24 = vmov 0.0   ;;  %v98_v29 = vlaneseq }
  0x1e   :  { %v49_v2 = vld [vmem:[#allocation3] sm:$0xff]  ;;  %v78_v3 = vadd.f32 %v58_v1, %v57_v0  ;;  %v50_v4 = vld [vmem:[#allocation3 + $0x8] sm:$0xff]  ;;  %v59_v5 = vld [vmem:[#allocation3 + $0x50] sm:$0xff]  ;;  %48 = vst.msk [vmem:[#allocation2] sm:$0x3] %vm47_vm0, %v355_v24  ;;  %263 = vmatprep.subr.mxu0 %v355_v24  ;;  %vm356_vm1 = vmmov 0  }
  0x1f   :  { %v60_v6 = vld [vmem:[#allocation3 + $0x58] sm:$0xff]  ;;  %v66_v7 = vadd.f32 %v50_v4, %v49_v2  ;;  %v51_v8 = vld [vmem:[#allocation3 + $0x10] sm:$0xff]  ;;  %v61_v12 = vld [vmem:[#allocation3 + $0x60] sm:$0xff]  ;;  %271 = vmatprep.mubr.msk.f32.mxu0 %vm356_vm1, %v355_v24  ;;  %v99_v30 = vand.u32 127, %v98_v29  ;;  %v101_v35 = vshrl.u32 %v98_v29, 7  ;;  %vm109_vm2 = vcmask 130112  }
  0x20   :  { %v52_v9 = vld [vmem:[#allocation3 + $0x18] sm:$0xff]  ;;  %79 = vadd.xlane.f32.xlu1 %v78_v3  ;;  %v81_v10 = vadd.f32 %v60_v6, %v59_v5  ;;  %v62_v13 = vld [vmem:[#allocation3 + $0x68] sm:$0xff]  ;;  %v53_v14 = vld [vmem:[#allocation3 + $0x20] sm:$0xff]  ;;  %vm116_vm3 = vcmask 195712   ;;  %vm123_vm4 = vcmask 261312   ;;  %vm144_vm5 = vcmask 1041409  }
  0x21   :  { %67 = vadd.xlane.f32.xlu0 %v66_v7  ;;  %v69_v11 = vadd.f32 %v52_v9, %v51_v8  ;;  %v54_v15 = vld [vmem:[#allocation3 + $0x28] sm:$0xff]  ;;  %v84_v16 = vadd.f32 %v62_v13, %v61_v12  ;;  %v63_v18 = vld [vmem:[#allocation3 + $0x70] sm:$0xff]  ;;  %v64_v19 = vld [vmem:[#allocation3 + $0x78] sm:$0xff]  ;;  %v104_v33 = vadd.s32 4294967288, %v99_v30  ;;  %v111_v34 = vadd.s32 4294967280, %v99_v30  ;;  %s357_s26 = smov [#allocation8]  }
  0x22   :  { %v72_v17 = vadd.f32 %v54_v15, %v53_v14  ;;  %v55_v20 = vld [vmem:[#allocation3 + $0x30] sm:$0xff]  ;;  %v56_v21 = vld [vmem:[#allocation3 + $0x38] sm:$0xff]  ;;  %v87_v22 = vadd.f32 %v64_v19, %v63_v18  ;;  %v155_v27 = vld [vmem:[#allocation6 + $0x8] sm:$0xff]  ;;  %v118_v39 = vadd.s32 4294967272, %v99_v30  ;;  %v102_v41 = vsub.s32 %v99_v30, %v101_v35  ;;  %s246_s27 = sshll.u32 %s357_s26, 4  ;;  %s247_s27 = int_to_ptr.vmem [resolvable:$true] %s246_s27 }
  0x23   :  { %v75_v23 = vadd.f32 %v56_v21, %v55_v20  ;;  %v157_v25 = vld [vmem:[#allocation6 + $0x18] sm:$0xff]  ;;  %v156_v26 = vld [vmem:[#allocation6 + $0x10] sm:$0xff]  ;;  %v154_v28 = vld [vmem:[#allocation6] sm:$0xff]  ;;  %v107_v37 = vsub.s32 %v104_v33, %v101_v35  ;;  %v114_v40 = vsub.s32 %v111_v34, %v101_v35  ;;  %vm165_vm6 = vcmask 261120   ;;  %s323_s28 = scalar_lea.vmem %s247_s27, 32  ;;  %p328_p11 = scmp.lt.s32.totalorder %s247_s27, %s247_s27 }
  0x24   :  { %82 = vadd.xlane.f32.xlu1 %v81_v10  ;;  %264 = vmatpush3.msra.mxu0 %v157_v25  ;;  %v121_v45 = vsub.s32 %v118_v39, %v101_v35  ;;  %v256_v1 = vld [vmem:[%s394_s2] ss:$0 sm:$0xff]  ;;  %p324_p10 = scmp.ne.s32.totalorder %s247_s27, %s323_s28  ;;  %p329_p12 = scmp.lt.s32.totalorder %s323_s28, %s323_s28 }
  0x25   :  { %70 = vadd.xlane.f32.xlu0 %v69_v11  ;;  %265 = vmatprep.subr.mxu0 %v355_v24  ;;  %v65_v60 = vld [vmem:[#allocation2] sm:$0x3] }
  0x26   :  { %266 = vmatpush3.msra.mxu0 %v156_v26  ;;  %p330_p13 = por %p329_p12, %p328_p11 }
  0x27   :  { %267 = vmatprep.subr.mxu0 %v355_v24 }
  0x28   :  { %85 = vadd.xlane.f32.xlu1 %v84_v16  ;;  %268 = vmatpush3.msra.mxu0 %v155_v27  ;;  %p331_p0 = pnand %p330_p13, %p324_p10 }
  0x29   :  { %73 = vadd.xlane.f32.xlu0 %v72_v17  ;;  %269 = vmatprep.subr.mxu0 %v355_v24 }
  0x2a   :  { %270 = vmatpush3.msra.mxu0 %v154_v28 }
  0x2c   :  { %88 = vadd.xlane.f32.xlu1 %v87_v22 }
  0x2d   :  { %76 = vadd.xlane.f32.xlu0 %v75_v23 }
  0xa9   :  { %v80_v31 = vpop.xlane.xlu1 %79 }
  0xaa   :  { %v68_v32 = vpop.xlane.xlu0 %67  ;;  %v128_v48 = vrot.slane %v80_v31, %v102_v41 }
  0xab   :  { %v103_v50 = vrot.slane %v68_v32, %v102_v41 }
  0xad   :  { %v83_v36 = vpop.xlane.xlu1 %82 }
  0xae   :  { %v71_v38 = vpop.xlane.xlu0 %70  ;;  %v132_v43 = vrot.slane %v83_v36, %v107_v37 }
  0xaf   :  { %v108_v46 = vrot.slane %v71_v38, %v107_v37 }
  0xb0   :  { %v133_v52 = vsel %vm109_vm2, %v132_v43, %v128_v48 }
  0xb1   :  { %v86_v42 = vpop.xlane.xlu1 %85  ;;  %v110_v55 = vsel %vm109_vm2, %v108_v46, %v103_v50 }
  0xb2   :  { %v74_v44 = vpop.xlane.xlu0 %73  ;;  %v137_v47 = vrot.slane %v86_v42, %v114_v40 }
  0xb3   :  { %v115_v49 = vrot.slane %v74_v44, %v114_v40 }
  0xb4   :  { %v138_v56 = vsel %vm116_vm3, %v137_v47, %v133_v52 }
  0xb5   :  { %v89_v51 = vpop.xlane.xlu1 %88  ;;  %v117_v58 = vsel %vm116_vm3, %v115_v49, %v110_v55 }
  0xb6   :  { %v142_v53 = vrot.slane %v89_v51, %v121_v45  ;;  %v77_v54 = vpop.xlane.xlu0 %76 }
  0xb7   :  { %v122_v57 = vrot.slane %v77_v54, %v121_v45 }
  0xb8   :  { %v143_v59 = vsel %vm123_vm4, %v142_v53, %v138_v56 }
  0xb9   :  { %v124_v61 = vsel %vm123_vm4, %v122_v57, %v117_v58 }
  0xba   :  { %v145_v62 = vsel %vm144_vm5, %v143_v59, %v124_v61 }
  0xbb   :  { %v147_v63 = vadd.f32 %v145_v62, %v65_v60 }
  0xbd   :  { %149 = vst.msk [vmem:[#allocation2] sm:$0x3] %vm47_vm0, %v147_v63 }
  0xc4   :  { %v153_v0 = vld [vmem:[#allocation2] sm:$0x3] }
  0xc5   :  { %272 = vmatmul.mubr.msk.f32.vlgmr.msra.gmra.mxu0 %vm165_vm6, %v153_v0 }
 0x185   :  { %v235_v2 = vpop.f32.mrf.mxu0 }
 0x186   :  { %v236_v3 = vadd.f32 %v256_v1, %v235_v2 }
 0x187   :  { %v273_v4 = vpop.f32.mrf.mxu0 }
 0x188   :  { %239 = vst [vmem:[#allocation8] sm:$0x3] %v236_v3 }
 0x189   :  { %334 = shalt.err (!%p331_p0)
}
 0x18a   :  { %249 = dma.vmem_to_hbm [thread:$0]  %s247_s27, 32, %s395_s3, [#allocation5]  }
 0x18b   :  { %347 = dma.done.wait [#allocation5], 32  }
 0x18c   :  { %348 = vsyncadd [#allocation5], 4294967264 }
 0x18d   :  { %253 = vsyncpa [#allocation4], 1 }
 0x18e   :  { %254 = vsyncpa [#allocation7], 1 }
 0x18f   :  { %255 = vsyncpa [#allocation5], 1 }

</bundles_post_ra>
